<compile_context>
chip_gen: v7x
topology: tpu7x:2x2x1
jax: 0.10.0
libtpu: 0.0.40
codegen_flags: <defaults>
</compile_context>

<pallas_src>
import jax
import jax.numpy as jnp
from jax.experimental import pallas as pl
from jax.experimental.pallas import tpu as pltpu

LN_EPS = 1e-5


def _layer_norm(x):
    # PyTorch LayerNorm (elementwise_affine=False): biased variance, eps=1e-5.
    # var = E[x^2] - mu^2: the two row-reductions are independent, so they can
    # pipeline through the XLU instead of serializing mean -> subtract -> mean(xc^2).
    mu = jnp.mean(x, axis=-1, keepdims=True)
    ms = jnp.mean(x * x, axis=-1, keepdims=True)
    var = ms - mu * mu
    return (x - mu) * jax.lax.rsqrt(var + LN_EPS)


def vector_merge_kernel(xa_ref, xb_ref, wa_ref, ba_ref, wb_ref, bb_ref, o_ref):
    # One (TILE_B, *) batch tile per grid step; weights/biases are VMEM-resident.
    fa = jnp.maximum(_layer_norm(xa_ref[...].astype(jnp.float32)), 0.0)
    fb = jnp.maximum(_layer_norm(xb_ref[...].astype(jnp.float32)), 0.0)

    # NOTE: f32 weights are fine at these sizes; if Da/Db/O grow to >=256, cast
    # weights + activations to bf16 (keep preferred_element_type=f32 accumulation)
    # and re-derive tile sizes against v7x's 64 MiB VMEM.
    out = jnp.dot(fa, wa_ref[...], preferred_element_type=jnp.float32) + ba_ref[...]
    out = out + jnp.dot(fb, wb_ref[...], preferred_element_type=jnp.float32) + bb_ref[...]

    o_ref[...] = out.astype(o_ref.dtype)


def vector_merge_forward(xa, xb, wa, ba, wb, bb, *, tile_b=128):
    """VectorMerge (GatingType.NONE) over two input streams.

    xa: (B, Da), xb: (B, Db) float32
    wa: (Da, O), wb: (Db, O)   (kernel computes x @ W + b, i.e. PyTorch weight transposed)
    ba, bb: (1, O)
    """
    B, Da = xa.shape
    Bb, Db = xb.shape
    O = wa.shape[1]
    assert Bb == B
    assert wa.shape == (Da, O) and wb.shape == (Db, O)
    assert ba.shape == (1, O) and bb.shape == (1, O)

    tile_b = min(tile_b, B)
    assert B % tile_b == 0, "example requires batch divisible by tile_b"
    grid = (B // tile_b,)

    return pl.pallas_call(
        vector_merge_kernel,
        out_shape=jax.ShapeDtypeStruct((B, O), xa.dtype),
        grid=grid,
        in_specs=[
            pl.BlockSpec((tile_b, Da), lambda i: (i, 0)),   # xa: pipelined over batch
            pl.BlockSpec((tile_b, Db), lambda i: (i, 0)),   # xb: pipelined over batch
            pl.BlockSpec((Da, O), lambda i: (0, 0)),        # weights stay resident
            pl.BlockSpec((1, O), lambda i: (0, 0)),
            pl.BlockSpec((Db, O), lambda i: (0, 0)),
            pl.BlockSpec((1, O), lambda i: (0, 0)),
        ],
        out_specs=pl.BlockSpec((tile_b, O), lambda i: (i, 0)),
        compiler_params=pltpu.CompilerParams(
            # Batch tiles are independent -> shard the grid across TensorCores on v7x.
            dimension_semantics=("parallel",),
        ),
    )(xa, xb, wa, ba, wb, bb)


def _layer_norm_ref(x):
    mu = jnp.mean(x, axis=-1, keepdims=True)
    xc = x - mu
    var = jnp.mean(xc * xc, axis=-1, keepdims=True)
    return xc * jax.lax.rsqrt(var + LN_EPS)


def reference_forward(xa, xb, wa, ba, wb, bb):
    """Pure-JAX reference mirroring the PyTorch VectorMerge (GatingType.NONE)."""
    fa = jnp.maximum(_layer_norm_ref(xa), 0.0)
    fb = jnp.maximum(_layer_norm_ref(xb), 0.0)
    ya = fa @ wa + ba
    yb = fb @ wb + bb
    return ya + yb


if __name__ == "__main__":
    # Module config: input_sizes={"a": 128, "b": 64}, output_size=128,
    # gating_type=GatingType.NONE, use_layer_norm=True, affine_layer_norm=False.
    B = 256      # batch rows; tiled 128 per grid step -> grid=(2,)
    Da = 128     # input size of stream "a"
    Db = 64      # input size of stream "b"
    O = 128      # output_size -> lane-dense (128-wide) unmasked output stores

    key = jax.random.PRNGKey(0)
    kxa, kxb, kwa, kwb, kba, kbb = jax.random.split(key, 6)

    xa = jax.random.normal(kxa, (B, Da), dtype=jnp.float32)
    xb = jax.random.normal(kxb, (B, Db), dtype=jnp.float32)

    wa = 0.02 * jax.random.normal(kwa, (Da, O), dtype=jnp.float32)
    wb = 0.02 * jax.random.normal(kwb, (Db, O), dtype=jnp.float32)
    ba = 0.01 * jax.random.normal(kba, (1, O), dtype=jnp.float32)
    bb = 0.01 * jax.random.normal(kbb, (1, O), dtype=jnp.float32)

    out = vector_merge_forward(xa, xb, wa, ba, wb, bb, tile_b=128)
    out = jax.block_until_ready(out)

    ref = reference_forward(xa, xb, wa, ba, wb, bb)
    assert out.shape == (B, O)
    assert jnp.allclose(out, ref, atol=1e-4, rtol=1e-4), "mismatch vs reference"

    print("KERNEL_OK")
</pallas_src>

<mosaic_0001>
module attributes {stable_mosaic.version = 11 : i64} {
  func.func @vector_merge_kernel(%arg0: i32, %arg1: memref<128x128xf32, #tpu.memory_space<vmem>>, %arg2: memref<128x64xf32, #tpu.memory_space<vmem>>, %arg3: memref<128x128xf32, #tpu.memory_space<vmem>>, %arg4: memref<1x128xf32, #tpu.memory_space<vmem>>, %arg5: memref<64x128xf32, #tpu.memory_space<vmem>>, %arg6: memref<1x128xf32, #tpu.memory_space<vmem>>, %arg7: memref<128x128xf32, #tpu.memory_space<vmem>>) attributes {dimension_semantics = [#tpu.dimension_semantics<parallel>], iteration_bounds = array<i64: 2>, scalar_prefetch = 0 : i64, scratch_operands = 0 : i64, tpu.core_type = #tpu.core_type<tc>, window_params = [{transform_indices = @transform_0, window_bounds = array<i64: 128, 128>}, {transform_indices = @transform_1, window_bounds = array<i64: 128, 64>}, {pipeline_mode = #tpu.pipeline_mode<synchronous>, transform_indices = @transform_2, window_bounds = array<i64: 128, 128>}, {pipeline_mode = #tpu.pipeline_mode<synchronous>, transform_indices = @transform_3, window_bounds = array<i64: 1, 128>}, {pipeline_mode = #tpu.pipeline_mode<synchronous>, transform_indices = @transform_4, window_bounds = array<i64: 64, 128>}, {pipeline_mode = #tpu.pipeline_mode<synchronous>, transform_indices = @transform_5, window_bounds = array<i64: 1, 128>}, {transform_indices = @transform_6, window_bounds = array<i64: 128, 128>}]} {
    %c0 = arith.constant 0 : index
    %c0_0 = arith.constant 0 : index
    %0 = vector.load %arg1[%c0, %c0_0] : memref<128x128xf32, #tpu.memory_space<vmem>>, vector<128x128xf32>
    %cst = arith.constant dense<0.000000e+00> : vector<128xf32>
    %1 = vector.multi_reduction <add>, %0, %cst [1] : vector<128x128xf32> to vector<128xf32>
    %2 = vector.shape_cast %1 : vector<128xf32> to vector<128x1xf32>
    %cst_1 = arith.constant 1.280000e+02 : f32
    %3 = vector.broadcast %cst_1 : f32 to vector<128x1xf32>
    %4 = arith.divf %2, %3 : vector<128x1xf32>
    %5 = arith.mulf %0, %0 : vector<128x128xf32>
    %cst_2 = arith.constant dense<0.000000e+00> : vector<128xf32>
    %6 = vector.multi_reduction <add>, %5, %cst_2 [1] : vector<128x128xf32> to vector<128xf32>
    %7 = vector.shape_cast %6 : vector<128xf32> to vector<128x1xf32>
    %cst_3 = arith.constant 1.280000e+02 : f32
    %8 = vector.broadcast %cst_3 : f32 to vector<128x1xf32>
    %9 = arith.divf %7, %8 : vector<128x1xf32>
    %10 = arith.mulf %4, %4 : vector<128x1xf32>
    %11 = arith.subf %9, %10 : vector<128x1xf32>
    %12 = vector.broadcast %4 : vector<128x1xf32> to vector<128x128xf32>
    %13 = arith.subf %0, %12 : vector<128x128xf32>
    %cst_4 = arith.constant 9.99999974E-6 : f32
    %14 = vector.broadcast %cst_4 : f32 to vector<128x1xf32>
    %15 = arith.addf %11, %14 : vector<128x1xf32>
    %16 = math.rsqrt %15 : vector<128x1xf32>
    %17 = vector.broadcast %16 : vector<128x1xf32> to vector<128x128xf32>
    %18 = arith.mulf %13, %17 : vector<128x128xf32>
    %cst_5 = arith.constant 0.000000e+00 : f32
    %19 = vector.broadcast %cst_5 : f32 to vector<128x128xf32>
    %20 = arith.maximumf %18, %19 : vector<128x128xf32>
    %c0_6 = arith.constant 0 : index
    %c0_7 = arith.constant 0 : index
    %21 = vector.load %arg2[%c0_6, %c0_7] : memref<128x64xf32, #tpu.memory_space<vmem>>, vector<128x64xf32>
    %cst_8 = arith.constant dense<0.000000e+00> : vector<128xf32>
    %22 = vector.multi_reduction <add>, %21, %cst_8 [1] : vector<128x64xf32> to vector<128xf32>
    %23 = vector.shape_cast %22 : vector<128xf32> to vector<128x1xf32>
    %cst_9 = arith.constant 6.400000e+01 : f32
    %24 = vector.broadcast %cst_9 : f32 to vector<128x1xf32>
    %25 = arith.divf %23, %24 : vector<128x1xf32>
    %26 = arith.mulf %21, %21 : vector<128x64xf32>
    %cst_10 = arith.constant dense<0.000000e+00> : vector<128xf32>
    %27 = vector.multi_reduction <add>, %26, %cst_10 [1] : vector<128x64xf32> to vector<128xf32>
    %28 = vector.shape_cast %27 : vector<128xf32> to vector<128x1xf32>
    %cst_11 = arith.constant 6.400000e+01 : f32
    %29 = vector.broadcast %cst_11 : f32 to vector<128x1xf32>
    %30 = arith.divf %28, %29 : vector<128x1xf32>
    %31 = arith.mulf %25, %25 : vector<128x1xf32>
    %32 = arith.subf %30, %31 : vector<128x1xf32>
    %33 = vector.broadcast %25 : vector<128x1xf32> to vector<128x64xf32>
    %34 = arith.subf %21, %33 : vector<128x64xf32>
    %cst_12 = arith.constant 9.99999974E-6 : f32
    %35 = vector.broadcast %cst_12 : f32 to vector<128x1xf32>
    %36 = arith.addf %32, %35 : vector<128x1xf32>
    %37 = math.rsqrt %36 : vector<128x1xf32>
    %38 = vector.broadcast %37 : vector<128x1xf32> to vector<128x64xf32>
    %39 = arith.mulf %34, %38 : vector<128x64xf32>
    %cst_13 = arith.constant 0.000000e+00 : f32
    %40 = vector.broadcast %cst_13 : f32 to vector<128x64xf32>
    %41 = arith.maximumf %39, %40 : vector<128x64xf32>
    %c0_14 = arith.constant 0 : index
    %c0_15 = arith.constant 0 : index
    %42 = vector.load %arg3[%c0_14, %c0_15] : memref<128x128xf32, #tpu.memory_space<vmem>>, vector<128x128xf32>
    %cst_16 = arith.constant dense<0.000000e+00> : vector<128x128xf32>
    %43 = tpu.matmul %20, %42, %cst_16 {dimension_numbers = #tpu.dot_dimension_numbers<[1], [0], [0], [1], [0, 0, 1, 1], [], []>} : vector<128x128xf32>, vector<128x128xf32>, vector<128x128xf32> -> vector<128x128xf32>
    %c0_17 = arith.constant 0 : index
    %c0_18 = arith.constant 0 : index
    %44 = vector.load %arg4[%c0_17, %c0_18] : memref<1x128xf32, #tpu.memory_space<vmem>>, vector<1x128xf32>
    %45 = vector.broadcast %44 : vector<1x128xf32> to vector<128x128xf32>
    %46 = arith.addf %43, %45 : vector<128x128xf32>
    %c0_19 = arith.constant 0 : index
    %c0_20 = arith.constant 0 : index
    %47 = vector.load %arg5[%c0_19, %c0_20] : memref<64x128xf32, #tpu.memory_space<vmem>>, vector<64x128xf32>
    %cst_21 = arith.constant dense<0.000000e+00> : vector<128x128xf32>
    %48 = tpu.matmul %41, %47, %cst_21 {dimension_numbers = #tpu.dot_dimension_numbers<[1], [0], [0], [1], [0, 0, 1, 1], [], []>} : vector<128x64xf32>, vector<64x128xf32>, vector<128x128xf32> -> vector<128x128xf32>
    %49 = arith.addf %46, %48 : vector<128x128xf32>
    %c0_22 = arith.constant 0 : index
    %c0_23 = arith.constant 0 : index
    %50 = vector.load %arg6[%c0_22, %c0_23] : memref<1x128xf32, #tpu.memory_space<vmem>>, vector<1x128xf32>
    %51 = vector.broadcast %50 : vector<1x128xf32> to vector<128x128xf32>
    %52 = arith.addf %49, %51 : vector<128x128xf32>
    %c0_24 = arith.constant 0 : index
    %c0_25 = arith.constant 0 : index
    %53 = vector.load %arg7[%c0_24, %c0_25] : memref<128x128xf32, #tpu.memory_space<vmem>>, vector<128x128xf32>
    tpu.vector_store %arg7[%c0_24, %c0_25], %52 {strides = array<i32>} : memref<128x128xf32, #tpu.memory_space<vmem>>, vector<128x128xf32>,
    return
  }
  func.func @transform_0(%arg0: i32) -> (i32, i32) {
    %c0_i32 = arith.constant 0 : i32
    %c0_i32_0 = arith.constant 0 : i32
    return %arg0, %c0_i32 : i32, i32
  }
  func.func @transform_1(%arg0: i32) -> (i32, i32) {
    %c0_i32 = arith.constant 0 : i32
    %c0_i32_0 = arith.constant 0 : i32
    return %arg0, %c0_i32 : i32, i32
  }
  func.func @transform_2(%arg0: i32) -> (i32, i32) {
    %c0_i32 = arith.constant 0 : i32
    %c0_i32_0 = arith.constant 0 : i32
    %c0_i32_1 = arith.constant 0 : i32
    return %c0_i32, %c0_i32_0 : i32, i32
  }
  func.func @transform_3(%arg0: i32) -> (i32, i32) {
    %c0_i32 = arith.constant 0 : i32
    %c0_i32_0 = arith.constant 0 : i32
    %c0_i32_1 = arith.constant 0 : i32
    return %c0_i32, %c0_i32_0 : i32, i32
  }
  func.func @transform_4(%arg0: i32) -> (i32, i32) {
    %c0_i32 = arith.constant 0 : i32
    %c0_i32_0 = arith.constant 0 : i32
    %c0_i32_1 = arith.constant 0 : i32
    return %c0_i32, %c0_i32_0 : i32, i32
  }
  func.func @transform_5(%arg0: i32) -> (i32, i32) {
    %c0_i32 = arith.constant 0 : i32
    %c0_i32_0 = arith.constant 0 : i32
    %c0_i32_1 = arith.constant 0 : i32
    return %c0_i32, %c0_i32_0 : i32, i32
  }
  func.func @transform_6(%arg0: i32) -> (i32, i32) {
    %c0_i32 = arith.constant 0 : i32
    %c0_i32_0 = arith.constant 0 : i32
    return %arg0, %c0_i32 : i32, i32
  }
}

</mosaic_0001>

<bundles_post_ra>
// kernel: tpu_custom_call.1
= control target key start
LH: loop header
LB: loop body
LE: loop exit
PB: predicated region body
PF: predicated region fallthrough
CT: control target
= control target key end

     0   :  { %11 = vsyncpa [#allocation3], 0  ;;  %s2505_s0 = inlined_call_operand.vmem [shape: f32[256,128], index: 0, kind: input, shape index: {}]   ;;  %s2506_s1 = inlined_call_operand.vmem [shape: f32[256,64], index: 1, kind: input, shape index: {}]   ;;  %s2507_s2 = inlined_call_operand.vmem [shape: f32[128,128], index: 2, kind: input, shape index: {}]   ;;  %s2508_s3 = inlined_call_operand.vmem [shape: f32[1,128], index: 3, kind: input, shape index: {}]   ;;  %s2509_s4 = inlined_call_operand.hbm [shape: f32[64,128], index: 4, kind: input, shape index: {}]   ;;  %s2510_s5 = inlined_call_operand.vmem [shape: f32[1,128], index: 5, kind: input, shape index: {}]   ;;  %s2511_s6 = inlined_call_operand.hbm [shape: f32[256,128], index: 6, kind: output, shape index: {}]  }
   0x1   :  { %12 = vsyncpa [#allocation4], 0 }
   0x2   :  { %14 = vsyncpa [#allocation4 + $0x1], 0  ;;  %s1851_s21 = smov 0   ;;  %s1853_s22 = smov 0  }
   0x3   :  { %s1855_s23 = smov 0   ;;  %s1857_s24 = smov 0  }
   0x4 LB: > { %s1872_s25 = sadd.s32 4294967295, %s1808_s24   ;;  %s1329_s26 = sadd.s32 4294967294, %s1808_s24   ;;  %s1808_s24 = sphi %s1857_s24, %s2527_s24   ;;  %s1804_s23 = sphi %s1855_s23, %s2526_s23   ;;  %s1800_s22 = sphi %s1853_s22, %s2525_s22   ;;  %s1796_s21 = sphi %s1851_s21, %s2524_s21  }
   0x5   : > { %s1876_s27 = sadd.s32 1, %s1808_s24   ;;  %s163_s28 = sadd.s32 1, %s1804_s23 }
   0x6   : > { %s160_s29 = ssub.s32 %s1808_s24, %s1876_s27  ;;  %p173_p0 = scmp.ne.s32.totalorder %s1804_s23, %s1800_s22 }
   0x7   : > { %p161_p1 = scmp.eq.s32.totalorder %s160_s29, 0  ;;  %p174_p2 = scmp.eq.s32.totalorder %s1872_s25, 1 }
   0x8   : > { %p179_p3 = scmp.ne.s32.totalorder %s1800_s22, %s1796_s21  ;;  %p180_p4 = scmp.eq.s32.totalorder %s1329_s26, 1 }
   0x9   : > { %s1887_s30 = scalar_select %p161_p1, %s1804_s23, %s163_s28  }
   0xa   : > { %p1889_p5 = por %p174_p2, %p173_p0  ;;  %p1893_p6 = por %p180_p4, %p179_p3 }
   0xb   : > { %p1330_p7 = scmp.ge.s32.totalorder %s1808_s24, 1  ;;  %p187_p8 = scmp.lt.s32.totalorder %s1808_s24, 3 }
   0xc   : > { %s2515_s7 = scalar_select %p1889_p5, 1, 0 }
   0xd   : > { %s2516_s8 = scalar_select %p1893_p6, 1, 0 }
   0xe   : > { %p2512_p9 = scmp.eq.s32.totalorder %s1872_s25, 0  ;;  %p1900_p10 = pnand %p1330_p7, %p187_p8 }
   0xf   : > { %s1810_s10 = smov [#allocation2]   ;;  %s1714_s15 = scalar_lea.hbm %s2509_s4, 1024 }
  0x10   : > { %s2517_s9 = scalar_select %p1900_p10, 1, 0 }
  0x11   : > { %s205_s11 = sshll.u32 %s1810_s10, 4  ;;  %p1602_p11 = pneg %p1900_p10  ;;  %s206_s11 = int_to_ptr.vmem [resolvable:$true] %s205_s11 }
  0x12   : > { %p1715_p13 = scmp.ne.s32.totalorder %s2509_s4, %s1714_s15  ;;  %p1721_p3 = scmp.lt.u32.totalorder %s1714_s15, %s2509_s4 }
  0x13   : > { %p1908_p12 = pnand %p2512_p9, %p1602_p11 }
  0x15   : > { %p1716_p0 = pneg %p1908_p12 }
  0x17   : > { %p1717_p1 = pnand %p1716_p0, %p1715_p13 }
  0x19   : > { %p1718_p2 = pneg %p1717_p1 }
  0x1b   : > { %p1723_p4 = pnand %p1721_p3, %p1718_p2 }
  0x1d   : > { %1726 = shalt.err (!%p1723_p4)
}
  0x1e   : > { %s1727_s20 = scalar_lea.vmem %s206_s11, 1024  ;;  %p1735_p9 = scmp.lt.s32.totalorder %s206_s11, %s206_s11 }
  0x1f   : > { %p1728_p7 = scmp.ne.s32.totalorder %s206_s11, %s1727_s20  ;;  %p1736_p6 = scmp.lt.s32.totalorder %s1727_s20, %s1727_s20 }
  0x21   : > { %p1730_p8 = pnand %p1728_p7, %p1716_p0  ;;  %p1737_p5 = por %p1736_p6, %p1735_p9 }
  0x23   : > { %p1731_p11 = pneg %p1730_p8 }
  0x25   : > { %p1738_p10 = pnand %p1737_p5, %p1731_p11 }
  0x27   : > { %1741 = shalt.err (!%p1738_p10)
}
  0x28   : > { %s1811_s26 = smov 128   ;;  %s1812_s28 = smov 8  }
  0x29   : > { %1605 = dma.hbm_to_vmem [thread:$0]  (!%p1908_p12), %s2509_s4, 1024, %s206_s11, [#allocation3], %s1811_s26, %s1811_s26, %s1812_s28  }
  0x2a   : > { %p2519_p13 = scmp.ne.s32.totalorder %s2517_s9, 0 }
  0x2b   : > { %p2520_p1 = scmp.eq.s32.totalorder (!%p2519_p13), %s1872_s25, 0 }
  0x2c   : > { %242 = sbr.rel (%p2519_p13) target bundleno = 580 (0x244), region = 44 }
  0x33   : > { %1787 = dma.done.wait (%p2520_p1), [#allocation3], 1024   ;;  %p2521_p0 = pmov %p2520_p1 }
  0x34   : > { %s1336_s13 = sshll.u32 %s1872_s25, 4  ;;  %vm547_vm0 = vcmask 523264   ;;  %v805_v12 = vld [vmem:[%s2507_s2] sm:$0xff]  ;;  %v806_v13 = vld [vmem:[%s2507_s2 + $0x8] sm:$0xff]  ;;  %v807_v16 = vld [vmem:[%s2507_s2 + $0x10] sm:$0xff]  ;;  %s274_s10 = sand.u32 1, %s1800_s22  }
  0x35   : > { %1789 = vsyncadd (%p2521_p0), [#allocation3], 4294966272  ;;  %p278_p5 = scmp.lt.s32.totalorder %s1336_s13, 31  ;;  %v808_v17 = vld [vmem:[%s2507_s2 + $0x18] sm:$0xff]  ;;  %v1516_v19 = vpack.c.bf16 %v806_v13, %v805_v12  ;;  %v809_v23 = vld [vmem:[%s2507_s2 + $0x20] sm:$0xff]  ;;  %s1363_s11 = sshll.u32 %s1872_s25, 11 }
  0x36   : > { %v1520_v20 = vpack.c.bf16 %v808_v17, %v807_v16  ;;  %v810_v24 = vld [vmem:[%s2507_s2 + $0x28] sm:$0xff]  ;;  %v811_v30 = vld [vmem:[%s2507_s2 + $0x30] sm:$0xff]  ;;  %v812_v31 = vld [vmem:[%s2507_s2 + $0x38] sm:$0xff]  ;;  %s2455_s20 = scalar_lea.hbm %s2511_s6, %s1363_s11  ;;  %s2464_s25 = scalar_lea.sflag [#allocation4], %s274_s10 }
  0x37   : > { %s2529_s13 = smov (!%p278_p5, %s1336_s13), 31  ;;  %1517 = vmatprep.subr.bf16.mxu1 %v1516_v19  ;;  %v1524_v26 = vpack.c.bf16 %v810_v24, %v809_v23  ;;  %v1528_v32 = vpack.c.bf16 %v812_v31, %v811_v30  ;;  %v813_v36 = vld [vmem:[%s2507_s2 + $0x40] sm:$0xff]  ;;  %v814_v37 = vld [vmem:[%s2507_s2 + $0x48] sm:$0xff]  ;;  %v815_v41 = vld [vmem:[%s2507_s2 + $0x50] sm:$0xff]  ;;  %p2522_p9 = scmp.ne.s32.totalorder %s2515_s7, 0 }
  0x38   : > { %s1337_s14 = sshll.u32 %s2529_s13, 3  ;;  %1519 = vmatpush3.bf16.msra.mxu1 %v1516_v19  ;;  %v1532_v38 = vpack.c.bf16 %v814_v37, %v813_v36  ;;  %v816_v42 = vld [vmem:[%s2507_s2 + $0x58] sm:$0xff]  ;;  %v973_v46 = vld [vmem:[#allocation2] sm:$0xff]  ;;  %v974_v47 = vld [vmem:[#allocation2 + $0x8] sm:$0xff]  ;;  %s1335_s13 = sshll.u32 %s274_s10, 7 }
  0x39   : > { %s1938_s16 = scalar_lea.vmem %s2505_s0, %s1337_s14  ;;  %s1943_s17 = scalar_lea.vmem %s2506_s1, %s1337_s14  ;;  %1521 = vmatprep.subr.bf16.mxu1 %v1520_v20  ;;  %v1536_v44 = vpack.c.bf16 %v816_v42, %v815_v41  ;;  %v1548_v49 = vpack.c.bf16 %v974_v47, %v973_v46  ;;  %v817_v50 = vld [vmem:[%s2507_s2 + $0x60] sm:$0xff]  ;;  %v818_v51 = vld [vmem:[%s2507_s2 + $0x68] sm:$0xff]  ;;  %v975_v55 = vld [vmem:[#allocation2 + $0x10] sm:$0xff] }
  0x3a   : > { %v1946_v0 = vld [vmem:[%s1938_s16] sm:$0xff]  ;;  %v1955_v3 = vld [vmem:[%s1943_s17 + $0x8] sm:$0xff]  ;;  %v1970_v9 = vld [vmem:[%s1938_s16 + $0x10] sm:$0xff]  ;;  %v1540_v53 = vpack.c.bf16 %v818_v51, %v817_v50  ;;  %s2407_s15 = scalar_lea.vmem [#allocation5], %s1335_s13  ;;  %s1813_s28 = smov [#allocation5]  }
  0x3b   : > { %v1949_v1 = vld [vmem:[%s1943_s17] sm:$0xff]  ;;  %306 = vadd.xlane.f32.xlu0 %v1946_v0  ;;  %v1958_v4 = vld [vmem:[%s1938_s16 + $0x8] sm:$0xff]  ;;  %v551_v5 = vsel %vm547_vm0, %v1955_v3, 0.0  ;;  %v355_v7 = vmul.f32 %v1946_v0, %v1946_v0  ;;  %v614_v11 = vmul.f32 %v1955_v3, %v1955_v3  ;;  %v1983_v14 = vld [vmem:[%s1938_s16 + $0x18] sm:$0xff]  ;;  %v357_v21 = vmul.f32 %v1970_v9, %v1970_v9  ;;  %1549 = vmatprep.subr.bf16.mxu0 %v1548_v49  ;;  %s1243_s9 = sshll.u32 %s2407_s15, 4  ;;  %s1746_s29 = sshll.u32 %s1813_s28, 4  ;;  %s2457_s9 = int_to_ptr.vmem [resolvable:$true] %s1243_s9  ;;  %s1747_s29 = int_to_ptr.vmem [resolvable:$false] %s1746_s29 }
  0x3c   : > { %v548_v2 = vsel %vm547_vm0, %v1949_v1, 0.0  ;;  %v356_v6 = vmul.f32 %v1958_v4, %v1958_v4  ;;  %v613_v8 = vmul.f32 %v1949_v1, %v1949_v1  ;;  %v1993_v18 = vld [vmem:[%s1943_s17 + $0x10] sm:$0xff]  ;;  %v2007_v25 = vld [vmem:[%s1943_s17 + $0x18] sm:$0xff]  ;;  %v358_v27 = vmul.f32 %v1983_v14, %v1983_v14  ;;  %1523 = vmatpush3.bf16.msra.mxu1 %v1520_v20  ;;  %v2022_v33 = vld [vmem:[%s1938_s16 + $0x20] sm:$0xff]  ;;  %1551 = vmatpush3.bf16.msra.mxu0 %v1548_v49  ;;  %s1742_s26 = scalar_lea.vmem %s2457_s9, 2048  ;;  %p1749_p2 = scmp.lt.s32.totalorder %s2457_s9, %s1747_s29 }
  0x3d   : > { %549 = vadd.xlane.f32.xlu1 %v548_v2  ;;  %v632_v15 = vsel %vm547_vm0, %v614_v11, 0.0  ;;  %v554_v22 = vsel %vm547_vm0, %v1993_v18, 0.0  ;;  %v557_v28 = vsel %vm547_vm0, %v2007_v25, 0.0  ;;  %v615_v29 = vmul.f32 %v1993_v18, %v1993_v18  ;;  %1525 = vmatprep.subr.bf16.mxu1 %v1524_v26  ;;  %v2035_v39 = vld [vmem:[%s1938_s16 + $0x28] sm:$0xff]  ;;  %v2045_v43 = vld [vmem:[%s1943_s17 + $0x20] sm:$0xff]  ;;  %v976_v56 = vld [vmem:[#allocation2 + $0x18] sm:$0xff]  ;;  %p1743_p6 = scmp.ne.s32.totalorder %s2457_s9, %s1742_s26 }
  0x3e   : > { %v629_v10 = vsel %vm547_vm0, %v613_v8, 0.0  ;;  %v616_v35 = vmul.f32 %v2007_v25, %v2007_v25  ;;  %v359_v45 = vmul.f32 %v2022_v33, %v2022_v33  ;;  %v560_v48 = vsel %vm547_vm0, %v2045_v43, 0.0  ;;  %v2059_v52 = vld [vmem:[%s1943_s17 + $0x28] sm:$0xff]  ;;  %v819_v60 = vld [vmem:[%s2507_s2 + $0x70] sm:$0xff]  ;;  %v820_v61 = vld [vmem:[%s2507_s2 + $0x78] sm:$0xff] }
  0x3f   : > { %308 = vadd.xlane.f32.xlu0 %v1958_v4  ;;  %v635_v34 = vsel %vm547_vm0, %v615_v29, 0.0  ;;  %v360_v54 = vmul.f32 %v2035_v39, %v2035_v39  ;;  %v563_v57 = vsel %vm547_vm0, %v2059_v52, 0.0  ;;  %v617_v58 = vmul.f32 %v2045_v43, %v2045_v43  ;;  %v2074_v63 = vld [vmem:[%s1938_s16 + $0x30] sm:$0xff]  ;;  %v977_v2 = vld [vmem:[#allocation2 + $0x20] sm:$0xff]  ;;  %v980_v12 = vld [vmem:[#allocation2 + $0x38] sm:$0xff]  ;;  %p1744_p10 = pnand %p1743_p6, %p2522_p9 }
  0x40   : > { %1527 = vmatpush3.bf16.msra.mxu1 %v1524_v26  ;;  %v638_v40 = vsel %vm547_vm0, %v616_v35, 0.0  ;;  %v1552_v59 = vpack.c.bf16 %v976_v56, %v975_v55  ;;  %v1544_v62 = vpack.c.bf16 %v820_v61, %v819_v60  ;;  %v979_v11 = vld [vmem:[#allocation2 + $0x30] sm:$0xff]  ;;  %v361_v17 = vmul.f32 %v2074_v63, %v2074_v63  ;;  %v2093_v20 = vld [vmem:[%s1943_s17 + $0x38] sm:$0xff]  ;;  %v2102_v24 = vld [vmem:[%s1938_s16 + $0x40] sm:$0xff] }
  0x41   : > { %552 = vadd.xlane.f32.xlu1 %v551_v5  ;;  %1529 = vmatprep.subr.bf16.mxu1 %v1528_v32  ;;  %v978_v5 = vld [vmem:[#allocation2 + $0x28] sm:$0xff]  ;;  %v2085_v16 = vld [vmem:[%s1943_s17 + $0x30] sm:$0xff]  ;;  %v2113_v30 = vld [vmem:[%s1943_s17 + $0x40] sm:$0xff]  ;;  %v363_v31 = vmul.f32 %v2102_v24, %v2102_v24  ;;  %p1745_p12 = pneg %p1744_p10 }
  0x42   : > { %1553 = vmatprep.subr.bf16.mxu0 %v1552_v59  ;;  %v1556_v8 = vpack.c.bf16 %v978_v5, %v977_v2  ;;  %v566_v19 = vsel %vm547_vm0, %v2085_v16, 0.0  ;;  %v619_v23 = vmul.f32 %v2085_v16, %v2085_v16  ;;  %v621_v37 = vmul.f32 %v2113_v30, %v2113_v30  ;;  %v2137_v42 = vld [vmem:[%s1938_s16 + $0x58] sm:$0xff]  ;;  %v2165_v56 = vld [vmem:[%s1938_s16 + $0x68] sm:$0xff] }
  0x43   : > { %373 = vadd.xlane.f32.xlu0 %v356_v6  ;;  %1555 = vmatpush3.bf16.msra.mxu0 %v1552_v59  ;;  %v641_v6 = vsel %vm547_vm0, %v617_v58, 0.0  ;;  %v366_v49 = vmul.f32 %v2137_v42, %v2137_v42  ;;  %v2169_v58 = vld [vmem:[%s1943_s17 + $0x60] sm:$0xff]  ;;  %v2177_v61 = vld [vmem:[%s1943_s17 + $0x68] sm:$0xff] }
  0x44   : > { %1531 = vmatpush3.bf16.msra.mxu1 %v1528_v32  ;;  %1557 = vmatprep.subr.bf16.mxu0 %v1556_v8  ;;  %v647_v26 = vsel %vm547_vm0, %v619_v23, 0.0  ;;  %v572_v32 = vsel %vm547_vm0, %v2113_v30, 0.0  ;;  %v584_v60 = vsel %vm547_vm0, %v2169_v58, 0.0  ;;  %v587_v2 = vsel %vm547_vm0, %v2177_v61, 0.0 }
  0x45   : > { %371 = vadd.xlane.f32.xlu1 %v355_v7  ;;  %1533 = vmatprep.subr.bf16.mxu1 %v1532_v38  ;;  %v618_v7 = vmul.f32 %v2059_v52, %v2059_v52  ;;  %v625_v5 = vmul.f32 %v2169_v58, %v2169_v58 }
  0x47   : > { %310 = vadd.xlane.f32.xlu0 %v1970_v9  ;;  %1559 = vmatpush3.bf16.msra.mxu0 %v1556_v8  ;;  %v644_v13 = vsel %vm547_vm0, %v618_v7, 0.0  ;;  %v665_v7 = vsel %vm547_vm0, %v625_v5, 0.0  ;;  %v626_v8 = vmul.f32 %v2177_v61, %v2177_v61 }
  0x48   : > { %1535 = vmatpush3.bf16.msra.mxu1 %v1532_v38  ;;  %v2130_v38 = vld [vmem:[%s1938_s16 + $0x50] sm:$0xff] }
  0x49   : > { %630 = vadd.xlane.f32.xlu1 %v629_v10  ;;  %1537 = vmatprep.subr.bf16.mxu1 %v1536_v44  ;;  %v2081_v10 = vld [vmem:[%s1938_s16 + $0x38] sm:$0xff]  ;;  %v365_v46 = vmul.f32 %v2130_v38, %v2130_v38 }
  0x4b   : > { %312 = vadd.xlane.f32.xlu0 %v1983_v14 }
  0x4c   : > { %1539 = vmatpush3.bf16.msra.mxu1 %v1536_v44 }
  0x4d   : > { %633 = vadd.xlane.f32.xlu1 %v632_v15  ;;  %1541 = vmatprep.subr.bf16.mxu1 %v1540_v53  ;;  %v1560_v15 = vpack.c.bf16 %v980_v12, %v979_v11  ;;  %v2193_v11 = vld [vmem:[%s1938_s16 + $0x78] sm:$0xff]  ;;  %v668_v12 = vsel %vm547_vm0, %v626_v8, 0.0 }
  0x4f   : > { %375 = vadd.xlane.f32.xlu0 %v357_v21  ;;  %1561 = vmatprep.subr.bf16.mxu0 %v1560_v15  ;;  %v362_v21 = vmul.f32 %v2081_v10, %v2081_v10 }
  0x50   : > { %1543 = vmatpush3.bf16.msra.mxu1 %v1540_v53  ;;  %1563 = vmatpush3.bf16.msra.mxu0 %v1560_v15  ;;  %v2158_v53 = vld [vmem:[%s1938_s16 + $0x60] sm:$0xff] }
  0x51   : > { %555 = vadd.xlane.f32.xlu1 %v554_v22  ;;  %1545 = vmatprep.subr.bf16.mxu1 %v1544_v62  ;;  %v569_v22 = vsel %vm547_vm0, %v2093_v20, 0.0  ;;  %v367_v59 = vmul.f32 %v2158_v53, %v2158_v53 }
  0x53   : > { %377 = vadd.xlane.f32.xlu0 %v358_v27  ;;  %v620_v27 = vmul.f32 %v2093_v20, %v2093_v20 }
  0x54   : > { %1547 = vmatpush3.bf16.msra.mxu1 %v1544_v62  ;;  %v368_v62 = vmul.f32 %v2165_v56, %v2165_v56 }
  0x55   : > { %558 = vadd.xlane.f32.xlu1 %v557_v28  ;;  %v2109_v28 = vld [vmem:[%s1938_s16 + $0x48] sm:$0xff]  ;;  %v650_v29 = vsel %vm547_vm0, %v620_v27, 0.0 }
  0x56   : > { %v364_v35 = vmul.f32 %v2109_v28, %v2109_v28 }
  0x57   : > { %314 = vadd.xlane.f32.xlu0 %v2022_v33 }
  0x59   : > { %636 = vadd.xlane.f32.xlu1 %v635_v34  ;;  %v2121_v34 = vld [vmem:[%s1943_s17 + $0x48] sm:$0xff] }
  0x5a   : > { %v575_v36 = vsel %vm547_vm0, %v2121_v34, 0.0  ;;  %v622_v41 = vmul.f32 %v2121_v34, %v2121_v34 }
  0x5b   : > { %316 = vadd.xlane.f32.xlu0 %v2035_v39 }
  0x5c   : > { %v656_v44 = vsel %vm547_vm0, %v622_v41, 0.0 }
  0x5d   : > { %639 = vadd.xlane.f32.xlu1 %v638_v40  ;;  %v653_v40 = vsel %vm547_vm0, %v621_v37, 0.0 }
  0x5f   : > { %379 = vadd.xlane.f32.xlu0 %v359_v45  ;;  %v2141_v45 = vld [vmem:[%s1943_s17 + $0x50] sm:$0xff] }
  0x60   : > { %v578_v47 = vsel %vm547_vm0, %v2141_v45, 0.0  ;;  %v623_v51 = vmul.f32 %v2141_v45, %v2141_v45 }
  0x61   : > { %561 = vadd.xlane.f32.xlu1 %v560_v48  ;;  %v2149_v48 = vld [vmem:[%s1943_s17 + $0x58] sm:$0xff] }
  0x62   : > { %v581_v50 = vsel %vm547_vm0, %v2149_v48, 0.0  ;;  %v624_v55 = vmul.f32 %v2149_v48, %v2149_v48 }
  0x63   : > { %381 = vadd.xlane.f32.xlu0 %v360_v54  ;;  %v659_v54 = vsel %vm547_vm0, %v623_v51, 0.0 }
  0x65   : > { %564 = vadd.xlane.f32.xlu1 %v563_v57  ;;  %v662_v57 = vsel %vm547_vm0, %v624_v55, 0.0 }
  0x67   : > { %318 = vadd.xlane.f32.xlu0 %v2074_v63 }
  0x69   : > { %642 = vadd.xlane.f32.xlu1 %v641_v6  ;;  %v2186_v6 = vld [vmem:[%s1938_s16 + $0x70] sm:$0xff]  ;;  %s1748_s16 = scalar_lea.vmem %s1747_s29, 4096 }
  0x6a   : > { %v369_v15 = vmul.f32 %v2186_v6, %v2186_v6  ;;  %p1750_p3 = scmp.lt.s32.totalorder %s1748_s16, %s1742_s26 }
  0x6b   : > { %320 = vadd.xlane.f32.xlu0 %v2081_v10 }
  0x6c   : > { %p1751_p4 = por %p1750_p3, %p1749_p2 }
  0x6d   : > { %645 = vadd.xlane.f32.xlu1 %v644_v13  ;;  %v2197_v13 = vld [vmem:[%s1943_s17 + $0x70] sm:$0xff] }
  0x6e   : > { %p1752_p7 = pnand %p1751_p4, %p1745_p12 }
  0x6f   : > { %383 = vadd.xlane.f32.xlu0 %v361_v17  ;;  %v590_v17 = vsel %vm547_vm0, %v2197_v13, 0.0 }
  0x71   : > { %567 = vadd.xlane.f32.xlu1 %v566_v19  ;;  %v2205_v19 = vld [vmem:[%s1943_s17 + $0x78] sm:$0xff] }
  0x72   : > { %v593_v23 = vsel %vm547_vm0, %v2205_v19, 0.0 }
  0x73   : > { %385 = vadd.xlane.f32.xlu0 %v362_v21  ;;  %v370_v21 = vmul.f32 %v2193_v11, %v2193_v11 }
  0x75   : > { %570 = vadd.xlane.f32.xlu1 %v569_v22  ;;  %v627_v22 = vmul.f32 %v2197_v13, %v2197_v13 }
  0x77   : > { %322 = vadd.xlane.f32.xlu0 %v2102_v24  ;;  %v671_v27 = vsel %vm547_vm0, %v627_v22, 0.0 }
  0x79   : > { %648 = vadd.xlane.f32.xlu1 %v647_v26  ;;  %v628_v26 = vmul.f32 %v2205_v19, %v2205_v19 }
  0x7b   : > { %324 = vadd.xlane.f32.xlu0 %v2109_v28 }
  0x7d   : > { %651 = vadd.xlane.f32.xlu1 %v650_v29  ;;  %v674_v29 = vsel %vm547_vm0, %v628_v26, 0.0 }
  0x7f   : > { %387 = vadd.xlane.f32.xlu0 %v363_v31 }
  0x81   : > { %573 = vadd.xlane.f32.xlu1 %v572_v32 }
  0x83   : > { %389 = vadd.xlane.f32.xlu0 %v364_v35 }
  0x85   : > { %576 = vadd.xlane.f32.xlu1 %v575_v36 }
  0x87   : > { %326 = vadd.xlane.f32.xlu0 %v2130_v38 }
  0x89   : > { %654 = vadd.xlane.f32.xlu1 %v653_v40 }
  0x8b   : > { %328 = vadd.xlane.f32.xlu0 %v2137_v42 }
  0x8d   : > { %657 = vadd.xlane.f32.xlu1 %v656_v44 }
  0x8f   : > { %391 = vadd.xlane.f32.xlu0 %v365_v46 }
  0x91   : > { %579 = vadd.xlane.f32.xlu1 %v578_v47 }
  0x93   : > { %393 = vadd.xlane.f32.xlu0 %v366_v49 }
  0x95   : > { %582 = vadd.xlane.f32.xlu1 %v581_v50 }
  0x97   : > { %330 = vadd.xlane.f32.xlu0 %v2158_v53 }
  0x99   : > { %660 = vadd.xlane.f32.xlu1 %v659_v54 }
  0x9b   : > { %332 = vadd.xlane.f32.xlu0 %v2165_v56 }
  0x9d   : > { %663 = vadd.xlane.f32.xlu1 %v662_v57 }
  0x9f   : > { %395 = vadd.xlane.f32.xlu0 %v367_v59 }
  0xa1   : > { %585 = vadd.xlane.f32.xlu1 %v584_v60 }
  0xa3   : > { %397 = vadd.xlane.f32.xlu0 %v368_v62 }
  0xa5   : > { %588 = vadd.xlane.f32.xlu1 %v587_v2 }
  0xa7   : > { %334 = vadd.xlane.f32.xlu0 %v2186_v6 }
  0xa9   : > { %666 = vadd.xlane.f32.xlu1 %v665_v7 }
  0xab   : > { %336 = vadd.xlane.f32.xlu0 %v2193_v11 }
  0xad   : > { %669 = vadd.xlane.f32.xlu1 %v668_v12 }
  0xaf   : > { %399 = vadd.xlane.f32.xlu0 %v369_v15 }
  0xb1   : > { %591 = vadd.xlane.f32.xlu1 %v590_v17 }
  0xb3   : > { %401 = vadd.xlane.f32.xlu0 %v370_v21 }
  0xb5   : > { %594 = vadd.xlane.f32.xlu1 %v593_v23 }
  0xb7   : > { %672 = vadd.xlane.f32.xlu0 %v671_v27 }
  0xb9   : > { %675 = vadd.xlane.f32.xlu1 %v674_v29 }
  0xc8   : > { %v307_v31 = vpop.xlane.xlu0 %306 }
  0xc9   : > { %v339_v40 = vmul.f32 0.0078125, %v307_v31 }
  0xca   : > { %v550_v32 = vpop.xlane.xlu1 %549 }
  0xcb   : > { %v419_v49 = vmul.f32 %v339_v40, %v339_v40  ;;  %v597_v50 = vmul.f32 0.015625, %v550_v32 }
  0xcc   : > { %v309_v35 = vpop.xlane.xlu0 %308 }
  0xcd   : > { %v340_v36 = vmul.f32 0.0078125, %v309_v35  ;;  %v693_v62 = vmul.f32 %v597_v50, %v597_v50 }
  0xce   : > { %v553_v37 = vpop.xlane.xlu1 %552 }
  0xcf   : > { %v420_v44 = vmul.f32 %v340_v36, %v340_v36  ;;  %v598_v2 = vmul.f32 0.015625, %v553_v37 }
  0xd0   : > { %v374_v41 = vpop.xlane.xlu0 %373 }
  0xd1   : > { %v404_v46 = vmul.f32 0.0078125, %v374_v41  ;;  %v694_v21 = vmul.f32 %v598_v2, %v598_v2 }
  0xd2   : > { %v372_v47 = vpop.xlane.xlu1 %371 }
  0xd3   : > { %v403_v51 = vmul.f32 0.0078125, %v372_v47  ;;  %v436_v54 = vsub.f32 %v404_v46, %v420_v44  ;;  %v452_v44 = vsub.f32 %v1958_v4, %v340_v36  ;;  %v725_v4 = vsub.f32 %v1949_v1, %v597_v50 }
  0xd4   : > { %v311_v57 = vpop.xlane.xlu0 %310 }
  0xd5   : > { %v435_v55 = vsub.f32 %v403_v51, %v419_v49  ;;  %v468_v59 = vadd.f32 1e-05, %v436_v54  ;;  %v2217_v15 = vmul.f32 0.0078125, %v311_v57  ;;  %v451_v57 = vsub.f32 %v1946_v0, %v339_v40 }
  0xd6   : > { %v631_v60 = vpop.xlane.xlu1 %630 }
  0xd7   : > { %v467_v5 = vadd.f32 1e-05, %v435_v55  ;;  %v677_v7 = vmul.f32 0.015625, %v631_v60  ;;  %1650 = vrsqrt.f32 %v468_v59  ;;  %v421_v29 = vmul.f32 %v2217_v15, %v2217_v15 }
  0xd8   : > { %v313_v12 = vpop.xlane.xlu0 %312 }
  0xd9   : > { %1652 = vrsqrt.f32 %v467_v5  ;;  %v709_v8 = vsub.f32 %v677_v7, %v693_v62  ;;  %v2221_v31 = vmul.f32 0.0078125, %v313_v12 }
  0xda   : > { %v634_v17 = vpop.xlane.xlu1 %633 }
  0xdb   : > { %v741_v22 = vadd.f32 1e-05, %v709_v8  ;;  %v678_v23 = vmul.f32 0.015625, %v634_v17  ;;  %v422_v49 = vmul.f32 %v2221_v31, %v2221_v31 }
  0xdc   : > { %v376_v27 = vpop.xlane.xlu0 %375 }
  0xdd   : > { %1654 = vrsqrt.f32 %v741_v22  ;;  %v710_v26 = vsub.f32 %v678_v23, %v694_v21  ;;  %v405_v32 = vmul.f32 0.0078125, %v376_v27 }
  0xde   : > { %v556_v35 = vpop.xlane.xlu1 %555 }
  0xdf   : > { %v742_v37 = vadd.f32 1e-05, %v710_v26  ;;  %v437_v41 = vsub.f32 %v405_v32, %v421_v29  ;;  %v2227_v60 = vmul.f32 0.015625, %v556_v35  ;;  %v726_v32 = vsub.f32 %v1955_v3, %v598_v2 }
  0xe0   : > { %v378_v46 = vpop.xlane.xlu0 %377 }
  0xe1   : > { %1656 = vrsqrt.f32 %v742_v37  ;;  %v1651_v47 = vpop.eup %1650  ;;  %v469_v51 = vadd.f32 1e-05, %v437_v41  ;;  %v406_v54 = vmul.f32 0.0078125, %v378_v46  ;;  %v695_v22 = vmul.f32 %v2227_v60, %v2227_v60 }
  0xe2   : > { %v559_v55 = vpop.xlane.xlu1 %558  ;;  %v500_v62 = vmul.f32 %v1651_v47, %v452_v44 }
  0xe3   : > { %v1653_v59 = vpop.eup %1652  ;;  %1658 = vrsqrt.f32 %v469_v51  ;;  %v438_v5 = vsub.f32 %v406_v54, %v422_v49  ;;  %v2232_v23 = vmul.f32 0.015625, %v559_v55  ;;  %v453_v49 = vsub.f32 %v1970_v9, %v2217_v15 }
  0xe4   : > { %v499_v7 = vmul.f32 %v1653_v59, %v451_v57  ;;  %v315_v8 = vpop.xlane.xlu0 %314  ;;  %v516_v40 = vmax.f32 %v500_v62, 0.0  ;;  %v454_v9 = vsub.f32 %v1983_v14, %v2221_v31  ;;  %v727_v14 = vsub.f32 %v1993_v18, %v2227_v60 }
  0xe5   : > { %v470_v36 = vadd.f32 1e-05, %v438_v5  ;;  %v2235_v1 = vmul.f32 0.0078125, %v315_v8  ;;  %v696_v41 = vmul.f32 %v2232_v23, %v2232_v23 }
  0xe6   : > { %v637_v12 = vpop.xlane.xlu1 %636  ;;  %v515_v17 = vmax.f32 %v499_v7, 0.0 }
  0xe7   : > { %v1655_v21 = vpop.eup %1654  ;;  %v679_v0 = vmul.f32 0.015625, %v637_v12  ;;  %1660 = vrsqrt.f32 %v470_v36  ;;  %v423_v2 = vmul.f32 %v2235_v1, %v2235_v1 }
  0xe8   : > { %1452 = vmatprep.mubr.f32.mxu1 %v515_v17  ;;  %v773_v26 = vmul.f32 %v1655_v21, %v725_v4  ;;  %v317_v29 = vpop.xlane.xlu0 %316 }
  0xe9   : > { %v711_v27 = vsub.f32 %v679_v0, %v695_v22  ;;  %1453 = vmatmul.mubr.f32.vlgmr.msra.gmra.mrb[0].mxu1 %v516_v40  ;;  %v2244_v55 = vmul.f32 0.0078125, %v317_v29 }
  0xea   : > { %v640_v50 = vpop.xlane.xlu1 %639  ;;  %v789_v35 = vmax.f32 %v773_v26, 0.0 }
  0xeb   : > { %v1657_v37 = vpop.eup %1656  ;;  %v743_v44 = vadd.f32 1e-05, %v711_v27  ;;  %v680_v46 = vmul.f32 0.015625, %v640_v50  ;;  %v424_v12 = vmul.f32 %v2244_v55, %v2244_v55 }
  0xec   : > { %1492 = vmatprep.mubr.msk.f32.mxu0 %vm547_vm0, %v789_v35  ;;  %v774_v47 = vmul.f32 %v1657_v37, %v726_v32  ;;  %v380_v54 = vpop.xlane.xlu0 %379 }
  0xed   : > { %1662 = vrsqrt.f32 %v743_v44  ;;  %v712_v51 = vsub.f32 %v680_v46, %v696_v41  ;;  %v1659_v3 = vpop.eup %1658  ;;  %v407_v57 = vmul.f32 0.0078125, %v380_v54 }
  0xee   : > { %v562_v59 = vpop.xlane.xlu1 %561  ;;  %v790_v62 = vmax.f32 %v774_v47, 0.0  ;;  %v501_v7 = vmul.f32 %v1659_v3, %v453_v49  ;;  %v728_v49 = vsub.f32 %v2007_v25, %v2232_v23 }
  0xef   : > { %v744_v5 = vadd.f32 1e-05, %v712_v51  ;;  %v439_v8 = vsub.f32 %v407_v57, %v423_v2  ;;  %v2251_v0 = vmul.f32 0.015625, %v562_v59 }
  0xf0   : > { %1493 = vmatmul.mubr.msk.f32.vlgmr.msra.gmra.mrb[0].mxu0 %vm547_vm0, %v790_v62  ;;  %v382_v15 = vpop.xlane.xlu0 %381  ;;  %v517_v4 = vmax.f32 %v501_v7, 0.0  ;;  %v455_v62 = vsub.f32 %v2022_v33, %v2235_v1  ;;  %v456_v33 = vsub.f32 %v2035_v39, %v2244_v55 }
  0xf1   : > { %1664 = vrsqrt.f32 %v744_v5  ;;  %v1661_v36 = vpop.eup %1660  ;;  %v471_v17 = vadd.f32 1e-05, %v439_v8  ;;  %v408_v21 = vmul.f32 0.0078125, %v382_v15  ;;  %v697_v35 = vmul.f32 %v2251_v0, %v2251_v0 }
  0xf2   : > { %v565_v22 = vpop.xlane.xlu1 %564  ;;  %1455 = vmatprep.mubr.f32.mxu1 %v517_v4  ;;  %v502_v40 = vmul.f32 %v1661_v36, %v454_v9  ;;  %v729_v39 = vsub.f32 %v2045_v43, %v2251_v0 }
  0xf3   : > { %1666 = vrsqrt.f32 %v471_v17  ;;  %v440_v26 = vsub.f32 %v408_v21, %v424_v12  ;;  %v2257_v37 = vmul.f32 0.015625, %v565_v22 }
  0xf4   : > { %v319_v27 = vpop.xlane.xlu0 %318  ;;  %v518_v29 = vmax.f32 %v502_v40, 0.0 }
  0xf5   : > { %v472_v31 = vadd.f32 1e-05, %v440_v26  ;;  %v2261_v51 = vmul.f32 0.0078125, %v319_v27  ;;  %v698_v3 = vmul.f32 %v2257_v37, %v2257_v37 }
  0xf6   : > { %v643_v32 = vpop.xlane.xlu1 %642  ;;  %1456 = vmatmul.mubr.f32.gmra.mrb[2].mxu1 %v518_v29 }
  0xf7   : > { %v1663_v50 = vpop.eup %1662  ;;  %v681_v41 = vmul.f32 0.015625, %v643_v32  ;;  %1668 = vrsqrt.f32 %v472_v31  ;;  %v425_v23 = vmul.f32 %v2261_v51, %v2261_v51 }
  0xf8   : > { %v775_v44 = vmul.f32 %v1663_v50, %v727_v14  ;;  %v321_v47 = vpop.xlane.xlu0 %320 }
  0xf9   : > { %v713_v46 = vsub.f32 %v681_v41, %v697_v35  ;;  %v2270_v8 = vmul.f32 0.0078125, %v321_v47 }
  0xfa   : > { %v646_v18 = vpop.xlane.xlu1 %645  ;;  %v791_v60 = vmax.f32 %v775_v44, 0.0 }
  0xfb   : > { %v1665_v54 = vpop.eup %1664  ;;  %v745_v2 = vadd.f32 1e-05, %v713_v46  ;;  %v682_v57 = vmul.f32 0.015625, %v646_v18  ;;  %v426_v40 = vmul.f32 %v2270_v8, %v2270_v8 }
  0xfc   : > { %1495 = vmatprep.mubr.msk.f32.mxu0 %vm547_vm0, %v791_v60  ;;  %v776_v59 = vmul.f32 %v1665_v54, %v728_v49  ;;  %v384_v7 = vpop.xlane.xlu0 %383 }
  0xfd   : > { %1670 = vrsqrt.f32 %v745_v2  ;;  %v714_v5 = vsub.f32 %v682_v57, %v698_v3  ;;  %v1667_v25 = vpop.eup %1666  ;;  %v409_v9 = vmul.f32 0.0078125, %v384_v7  ;;  %v730_v3 = vsub.f32 %v2059_v52, %v2257_v37 }
  0xfe   : > { %v568_v15 = vpop.xlane.xlu1 %567  ;;  %v792_v4 = vmax.f32 %v776_v59, 0.0  ;;  %v503_v12 = vmul.f32 %v1667_v25, %v455_v62  ;;  %v457_v25 = vsub.f32 %v2074_v63, %v2261_v51  ;;  %v458_v63 = vsub.f32 %v2081_v10, %v2270_v8 }
  0xff   : > { %v746_v36 = vadd.f32 1e-05, %v714_v5  ;;  %v441_v17 = vsub.f32 %v409_v9, %v425_v23  ;;  %v2277_v14 = vmul.f32 0.015625, %v568_v15 }
 0x100   : > { %1496 = vmatmul.mubr.msk.f32.gmra.mrb[2].mxu0 %vm547_vm0, %v792_v4  ;;  %v386_v1 = vpop.xlane.xlu0 %385  ;;  %v519_v21 = vmax.f32 %v503_v12, 0.0 }
 0x101   : > { %1672 = vrsqrt.f32 %v746_v36  ;;  %v1669_v22 = vpop.eup %1668  ;;  %v473_v26 = vadd.f32 1e-05, %v441_v17  ;;  %v410_v27 = vmul.f32 0.0078125, %v386_v1  ;;  %v699_v46 = vmul.f32 %v2277_v14, %v2277_v14 }
 0x102   : > { %v571_v29 = vpop.xlane.xlu1 %570  ;;  %1458 = vmatprep.mubr.f32.mxu1 %v519_v21  ;;  %v504_v31 = vmul.f32 %v1669_v22, %v456_v33  ;;  %v731_v10 = vsub.f32 %v2085_v16, %v2277_v14 }
 0x103   : > { %1674 = vrsqrt.f32 %v473_v26  ;;  %v442_v32 = vsub.f32 %v410_v27, %v426_v40  ;;  %v2283_v47 = vmul.f32 0.015625, %v571_v29 }
 0x104   : > { %v323_v50 = vpop.xlane.xlu0 %322  ;;  %v520_v35 = vmax.f32 %v504_v31, 0.0 }
 0x105   : > { %v474_v55 = vadd.f32 1e-05, %v442_v32  ;;  %v2287_v2 = vmul.f32 0.0078125, %v323_v50  ;;  %v700_v59 = vmul.f32 %v2283_v47, %v2283_v47 }
 0x106   : > { %v649_v41 = vpop.xlane.xlu1 %648  ;;  %1459 = vmatmul.mubr.f32.gmra.mrb[4].mxu1 %v520_v35 }
 0x107   : > { %v1671_v44 = vpop.eup %1670  ;;  %v683_v49 = vmul.f32 0.015625, %v649_v41  ;;  %1676 = vrsqrt.f32 %v474_v55  ;;  %v427_v37 = vmul.f32 %v2287_v2, %v2287_v2 }
 0x108   : > { %v777_v18 = vmul.f32 %v1671_v44, %v729_v39  ;;  %v325_v54 = vpop.xlane.xlu0 %324 }
 0x109   : > { %v715_v60 = vsub.f32 %v683_v49, %v699_v46  ;;  %v2296_v15 = vmul.f32 0.0078125, %v325_v54 }
 0x10a   : > { %v652_v43 = vpop.xlane.xlu1 %651  ;;  %v793_v0 = vmax.f32 %v777_v18, 0.0 }
 0x10b   : > { %v1673_v57 = vpop.eup %1672  ;;  %v747_v62 = vadd.f32 1e-05, %v715_v60  ;;  %v684_v5 = vmul.f32 0.015625, %v652_v43  ;;  %v428_v40 = vmul.f32 %v2296_v15, %v2296_v15 }
 0x10c   : > { %1498 = vmatprep.mubr.msk.f32.mxu0 %vm547_vm0, %v793_v0  ;;  %v778_v7 = vmul.f32 %v1673_v57, %v730_v3  ;;  %v388_v9 = vpop.xlane.xlu0 %387  ;;  %v732_v3 = vsub.f32 %v2093_v20, %v2283_v47 }
 0x10d   : > { %1678 = vrsqrt.f32 %v747_v62  ;;  %v716_v23 = vsub.f32 %v684_v5, %v700_v59  ;;  %v1675_v52 = vpop.eup %1674  ;;  %v411_v4 = vmul.f32 0.0078125, %v388_v9 }
 0x10e   : > { %v574_v36 = vpop.xlane.xlu1 %573  ;;  %v794_v12 = vmax.f32 %v778_v7, 0.0  ;;  %v505_v33 = vmul.f32 %v1675_v52, %v457_v25  ;;  %v459_v7 = vsub.f32 %v2102_v24, %v2287_v2  ;;  %v460_v24 = vsub.f32 %v2109_v28, %v2296_v15 }
 0x10f   : > { %v748_v17 = vadd.f32 1e-05, %v716_v23  ;;  %v443_v1 = vsub.f32 %v411_v4, %v427_v37  ;;  %v2303_v31 = vmul.f32 0.015625, %v574_v36 }
 0x110   : > { %1499 = vmatmul.mubr.msk.f32.gmra.mrb[4].mxu0 %vm547_vm0, %v794_v12  ;;  %v390_v51 = vpop.xlane.xlu0 %389  ;;  %v521_v21 = vmax.f32 %v505_v33, 0.0 }
 0x111   : > { %1680 = vrsqrt.f32 %v748_v17  ;;  %v1677_v22 = vpop.eup %1676  ;;  %v475_v26 = vadd.f32 1e-05, %v443_v1  ;;  %v412_v27 = vmul.f32 0.0078125, %v390_v51  ;;  %v701_v44 = vmul.f32 %v2303_v31, %v2303_v31 }
 0x112   : > { %v577_v29 = vpop.xlane.xlu1 %576  ;;  %1461 = vmatprep.mubr.f32.mxu1 %v521_v21  ;;  %v506_v32 = vmul.f32 %v1677_v22, %v458_v63  ;;  %v733_v28 = vsub.f32 %v2113_v30, %v2303_v31 }
 0x113   : > { %1682 = vrsqrt.f32 %v475_v26  ;;  %v444_v50 = vsub.f32 %v412_v27, %v428_v40  ;;  %v2309_v46 = vmul.f32 0.015625, %v577_v29 }
 0x114   : > { %v327_v35 = vpop.xlane.xlu0 %326  ;;  %v522_v39 = vmax.f32 %v506_v32, 0.0 }
 0x115   : > { %v476_v8 = vadd.f32 1e-05, %v444_v50  ;;  %v2313_v43 = vmul.f32 0.0078125, %v327_v35  ;;  %v702_v57 = vmul.f32 %v2309_v46, %v2309_v46 }
 0x116   : > { %v655_v55 = vpop.xlane.xlu1 %654  ;;  %1462 = vmatmul.mubr.f32.gmra.mrb[6].mxu1 %v522_v39 }
 0x117   : > { %v1679_v41 = vpop.eup %1678  ;;  %v685_v49 = vmul.f32 0.015625, %v655_v55  ;;  %1684 = vrsqrt.f32 %v476_v8  ;;  %v429_v47 = vmul.f32 %v2313_v43, %v2313_v43 }
 0x118   : > { %v779_v18 = vmul.f32 %v1679_v41, %v731_v10  ;;  %v329_v54 = vpop.xlane.xlu0 %328 }
 0x119   : > { %v717_v60 = vsub.f32 %v685_v49, %v701_v44  ;;  %v2322_v9 = vmul.f32 0.0078125, %v329_v54  ;;  %v734_v49 = vsub.f32 %v2121_v34, %v2309_v46 }
 0x11a   : > { %v658_v16 = vpop.xlane.xlu1 %657  ;;  %v795_v14 = vmax.f32 %v779_v18, 0.0 }
 0x11b   : > { %v1681_v0 = vpop.eup %1680  ;;  %v749_v59 = vadd.f32 1e-05, %v717_v60  ;;  %v686_v62 = vmul.f32 0.015625, %v658_v16  ;;  %v430_v63 = vmul.f32 %v2322_v9, %v2322_v9 }
 0x11c   : > { %1501 = vmatprep.mubr.msk.f32.mxu0 %vm547_vm0, %v795_v14  ;;  %v780_v5 = vmul.f32 %v1681_v0, %v732_v3  ;;  %v392_v23 = vpop.xlane.xlu0 %391  ;;  %v461_v0 = vsub.f32 %v2130_v38, %v2313_v43  ;;  %v462_v38 = vsub.f32 %v2137_v42, %v2322_v9 }
 0x11d   : > { %1686 = vrsqrt.f32 %v749_v59  ;;  %v718_v25 = vsub.f32 %v686_v62, %v702_v57  ;;  %v1683_v20 = vpop.eup %1682  ;;  %v413_v52 = vmul.f32 0.0078125, %v392_v23 }
 0x11e   : > { %v580_v37 = vpop.xlane.xlu1 %579  ;;  %v796_v4 = vmax.f32 %v780_v5, 0.0  ;;  %v507_v12 = vmul.f32 %v1683_v20, %v459_v7 }
 0x11f   : > { %v750_v36 = vadd.f32 1e-05, %v718_v25  ;;  %v445_v17 = vsub.f32 %v413_v52, %v429_v47  ;;  %v2329_v40 = vmul.f32 0.015625, %v580_v37 }
 0x120   : > { %1502 = vmatmul.mubr.msk.f32.gmra.mrb[6].mxu0 %vm547_vm0, %v796_v4  ;;  %v394_v2 = vpop.xlane.xlu0 %393  ;;  %v523_v33 = vmax.f32 %v507_v12, 0.0 }
 0x121   : > { %1688 = vrsqrt.f32 %v750_v36  ;;  %v1685_v1 = vpop.eup %1684  ;;  %v477_v51 = vadd.f32 1e-05, %v445_v17  ;;  %v414_v21 = vmul.f32 0.0078125, %v394_v2  ;;  %v703_v39 = vmul.f32 %v2329_v40, %v2329_v40 }
 0x122   : > { %v583_v22 = vpop.xlane.xlu1 %582  ;;  %1464 = vmatprep.mubr.f32.mxu1 %v523_v33  ;;  %v508_v26 = vmul.f32 %v1685_v1, %v460_v24  ;;  %v735_v42 = vsub.f32 %v2141_v45, %v2329_v40 }
 0x123   : > { %1690 = vrsqrt.f32 %v477_v51  ;;  %v446_v27 = vsub.f32 %v414_v21, %v430_v63  ;;  %v2335_v10 = vmul.f32 0.015625, %v583_v22 }
 0x124   : > { %v331_v29 = vpop.xlane.xlu0 %330  ;;  %v524_v32 = vmax.f32 %v508_v26, 0.0 }
 0x125   : > { %v478_v15 = vadd.f32 1e-05, %v446_v27  ;;  %v2339_v18 = vmul.f32 0.0078125, %v331_v29  ;;  %v704_v54 = vmul.f32 %v2335_v10, %v2335_v10 }
 0x126   : > { %v661_v50 = vpop.xlane.xlu1 %660  ;;  %1465 = vmatmul.mubr.f32.gmra.mrb[8].mxu1 %v524_v32 }
 0x127   : > { %v1687_v35 = vpop.eup %1686  ;;  %v687_v8 = vmul.f32 0.015625, %v661_v50  ;;  %1692 = vrsqrt.f32 %v478_v15  ;;  %v431_v46 = vmul.f32 %v2339_v18, %v2339_v18  ;;  %v736_v15 = vsub.f32 %v2149_v48, %v2335_v10 }
 0x128   : > { %v781_v55 = vmul.f32 %v1687_v35, %v733_v28  ;;  %v333_v44 = vpop.xlane.xlu0 %332 }
 0x129   : > { %v719_v41 = vsub.f32 %v687_v8, %v703_v39  ;;  %v2348_v62 = vmul.f32 0.0078125, %v333_v44  ;;  %v463_v44 = vsub.f32 %v2158_v53, %v2339_v18 }
 0x12a   : > { %v664_v30 = vpop.xlane.xlu1 %663  ;;  %v797_v31 = vmax.f32 %v781_v55, 0.0 }
 0x12b   : > { %v1689_v60 = vpop.eup %1688  ;;  %v751_v3 = vadd.f32 1e-05, %v719_v41  ;;  %v688_v16 = vmul.f32 0.015625, %v664_v30  ;;  %v432_v4 = vmul.f32 %v2348_v62, %v2348_v62 }
 0x12c   : > { %1504 = vmatprep.mubr.msk.f32.mxu0 %vm547_vm0, %v797_v31  ;;  %v782_v14 = vmul.f32 %v1689_v60, %v734_v49  ;;  %v396_v59 = vpop.xlane.xlu0 %395 }
 0x12d   : > { %1694 = vrsqrt.f32 %v751_v3  ;;  %v720_v57 = vsub.f32 %v688_v16, %v704_v54  ;;  %v1691_v34 = vpop.eup %1690  ;;  %v415_v5 = vmul.f32 0.0078125, %v396_v59 }
 0x12e   : > { %v586_v7 = vpop.xlane.xlu1 %585  ;;  %v798_v25 = vmax.f32 %v782_v14, 0.0  ;;  %v509_v20 = vmul.f32 %v1691_v34, %v461_v0 }
 0x12f   : > { %v752_v23 = vadd.f32 1e-05, %v720_v57  ;;  %v447_v47 = vsub.f32 %v415_v5, %v431_v46  ;;  %v2355_v24 = vmul.f32 0.015625, %v586_v7  ;;  %v464_v57 = vsub.f32 %v2165_v56, %v2348_v62 }
 0x130   : > { %1505 = vmatmul.mubr.msk.f32.gmra.mrb[8].mxu0 %vm547_vm0, %v798_v25  ;;  %v398_v43 = vpop.xlane.xlu0 %397  ;;  %v525_v52 = vmax.f32 %v509_v20, 0.0 }
 0x131   : > { %1696 = vrsqrt.f32 %v752_v23  ;;  %v1693_v37 = vpop.eup %1692  ;;  %v479_v36 = vadd.f32 1e-05, %v447_v47  ;;  %v416_v12 = vmul.f32 0.0078125, %v398_v43  ;;  %v705_v22 = vmul.f32 %v2355_v24, %v2355_v24 }
 0x132   : > { %v589_v17 = vpop.xlane.xlu1 %588  ;;  %1467 = vmatprep.mubr.f32.mxu1 %v525_v52  ;;  %v510_v2 = vmul.f32 %v1693_v37, %v462_v38  ;;  %v737_v52 = vsub.f32 %v2169_v58, %v2355_v24 }
 0x133   : > { %1698 = vrsqrt.f32 %v479_v36  ;;  %v448_v33 = vsub.f32 %v416_v12, %v432_v4  ;;  %v2361_v26 = vmul.f32 0.015625, %v589_v17 }
 0x134   : > { %v335_v1 = vpop.xlane.xlu0 %334  ;;  %v526_v63 = vmax.f32 %v510_v2, 0.0 }
 0x135   : > { %v480_v9 = vadd.f32 1e-05, %v448_v33  ;;  %v2365_v50 = vmul.f32 0.0078125, %v335_v1  ;;  %v706_v39 = vmul.f32 %v2361_v26, %v2361_v26 }
 0x136   : > { %v667_v51 = vpop.xlane.xlu1 %666  ;;  %1468 = vmatmul.mubr.f32.gmra.mrb[10].mxu1 %v526_v63  ;;  %v738_v63 = vsub.f32 %v2177_v61, %v2361_v26 }
 0x137   : > { %v1695_v21 = vpop.eup %1694  ;;  %v689_v27 = vmul.f32 0.015625, %v667_v51  ;;  %1700 = vrsqrt.f32 %v480_v9  ;;  %v433_v10 = vmul.f32 %v2365_v50, %v2365_v50  ;;  %v465_v24 = vsub.f32 %v2186_v6, %v2365_v50 }
 0x138   : > { %v783_v29 = vmul.f32 %v1695_v21, %v735_v42  ;;  %v337_v28 = vpop.xlane.xlu0 %336 }
 0x139   : > { %v721_v32 = vsub.f32 %v689_v27, %v705_v22  ;;  %v354_v31 = vmul.f32 0.0078125, %v337_v28 }
 0x13a   : > { %v670_v45 = vpop.xlane.xlu1 %669  ;;  %v799_v40 = vmax.f32 %v783_v29, 0.0 }
 0x13b   : > { %v1697_v35 = vpop.eup %1696  ;;  %v753_v8 = vadd.f32 1e-05, %v721_v32  ;;  %v690_v55 = vmul.f32 0.015625, %v670_v45  ;;  %v434_v34 = vmul.f32 %v354_v31, %v354_v31  ;;  %v466_v32 = vsub.f32 %v2193_v11, %v354_v31 }
 0x13c   : > { %1507 = vmatprep.mubr.msk.f32.mxu0 %vm547_vm0, %v799_v40  ;;  %v784_v41 = vmul.f32 %v1697_v35, %v736_v15  ;;  %v400_v30 = vpop.xlane.xlu0 %399 }
 0x13d   : > { %1702 = vrsqrt.f32 %v753_v8  ;;  %v722_v49 = vsub.f32 %v690_v55, %v706_v39  ;;  %v1699_v48 = vpop.eup %1698  ;;  %v417_v60 = vmul.f32 0.0078125, %v400_v30  ;;  %v2403_v30 = vld [vmem:[%s2510_s5] ss:$0 sm:$0xff] }
 0x13e   : > { %v592_v54 = vpop.xlane.xlu1 %591  ;;  %v800_v3 = vmax.f32 %v784_v41, 0.0  ;;  %v511_v14 = vmul.f32 %v1699_v48, %v463_v44 }
 0x13f   : > { %v754_v16 = vadd.f32 1e-05, %v722_v49  ;;  %v449_v0 = vsub.f32 %v417_v60, %v433_v10  ;;  %v611_v5 = vmul.f32 0.015625, %v592_v54 }
 0x140   : > { %1508 = vmatmul.mubr.msk.f32.gmra.mrb[10].mxu0 %vm547_vm0, %v800_v3  ;;  %v402_v53 = vpop.xlane.xlu0 %401  ;;  %v527_v18 = vmax.f32 %v511_v14, 0.0 }
 0x141   : > { %1704 = vrsqrt.f32 %v754_v16  ;;  %v1701_v59 = vpop.eup %1700  ;;  %v481_v46 = vadd.f32 1e-05, %v449_v0  ;;  %v418_v7 = vmul.f32 0.0078125, %v402_v53  ;;  %v707_v56 = vmul.f32 %v611_v5, %v611_v5 }
 0x142   : > { %v595_v25 = vpop.xlane.xlu1 %594  ;;  %1470 = vmatprep.mubr.f32.mxu1 %v527_v18  ;;  %v512_v20 = vmul.f32 %v1701_v59, %v464_v57  ;;  %v739_v15 = vsub.f32 %v2197_v13, %v611_v5  ;;  %v2393_v13 = vld [vmem:[%s2508_s3] ss:$0 sm:$0xff] }
 0x143   : > { %v612_v23 = vmul.f32 0.015625, %v595_v25  ;;  %1706 = vrsqrt.f32 %v481_v46  ;;  %v450_v47 = vsub.f32 %v418_v7, %v434_v34 }
 0x144   : > { %v673_v38 = vpop.xlane.xlu0 %672  ;;  %v528_v43 = vmax.f32 %v512_v20, 0.0 }
 0x145   : > { %v482_v62 = vadd.f32 1e-05, %v450_v47  ;;  %v691_v37 = vmul.f32 0.015625, %v673_v38  ;;  %v708_v12 = vmul.f32 %v612_v23, %v612_v23  ;;  %v740_v6 = vsub.f32 %v2205_v19, %v612_v23 }
 0x146   : > { %v676_v4 = vpop.xlane.xlu1 %675  ;;  %1471 = vmatmul.mubr.f32.gmra.mrb[12].mxu1 %v528_v43 }
 0x147   : > { %v1703_v36 = vpop.eup %1702  ;;  %v692_v17 = vmul.f32 0.015625, %v676_v4  ;;  %1708 = vrsqrt.f32 %v482_v62  ;;  %v723_v2 = vsub.f32 %v691_v37, %v707_v56 }
 0x148   : > { %v785_v33 = vmul.f32 %v1703_v36, %v737_v52 }
 0x149   : > { %v724_v1 = vsub.f32 %v692_v17, %v708_v12  ;;  %v755_v42 = vadd.f32 1e-05, %v723_v2 }
 0x14a   : > { %v801_v9 = vmax.f32 %v785_v33, 0.0 }
 0x14b   : > { %v1705_v51 = vpop.eup %1704  ;;  %v756_v21 = vadd.f32 1e-05, %v724_v1  ;;  %1710 = vrsqrt.f32 %v755_v42 }
 0x14c   : > { %1510 = vmatprep.mubr.msk.f32.mxu0 %vm547_vm0, %v801_v9  ;;  %v786_v58 = vmul.f32 %v1705_v51, %v738_v63 }
 0x14d   : > { %1712 = vrsqrt.f32 %v756_v21  ;;  %v1707_v22 = vpop.eup %1706 }
 0x14e   : > { %v802_v27 = vmax.f32 %v786_v58, 0.0  ;;  %v513_v29 = vmul.f32 %v1707_v22, %v465_v24 }
 0x150   : > { %1511 = vmatmul.mubr.msk.f32.gmra.mrb[12].mxu0 %vm547_vm0, %v802_v27  ;;  %v529_v61 = vmax.f32 %v513_v29, 0.0 }
 0x151   : > { %v1709_v26 = vpop.eup %1708 }
 0x152   : > { %1473 = vmatprep.mubr.f32.mxu1 %v529_v61  ;;  %v514_v28 = vmul.f32 %v1709_v26, %v466_v32 }
 0x154   : > { %v530_v45 = vmax.f32 %v514_v28, 0.0 }
 0x155   : > { %v1711_v40 = vpop.eup %1710 }
 0x156   : > { %1474 = vmatmul.mubr.f32.gmra.mrb[14].mxu1 %v530_v45  ;;  %v787_v35 = vmul.f32 %v1711_v40, %v739_v15 }
 0x157   : > { %v1713_v50 = vpop.eup %1712 }
 0x158   : > { %v788_v39 = vmul.f32 %v1713_v50, %v740_v6  ;;  %v803_v8 = vmax.f32 %v787_v35, 0.0 }
 0x15a   : > { %v804_v55 = vmax.f32 %v788_v39, 0.0  ;;  %1513 = vmatprep.mubr.msk.f32.mxu0 %vm547_vm0, %v803_v8 }
 0x15c   : > { %1514 = vmatmul.mubr.msk.f32.gmra.mrb[14].mxu0 %vm547_vm0, %v804_v55 }
 0x1bc   : > { %v1454_v11 = vpop.f32.mrb[0].mxu1 }
 0x1bd   : > { %v894_v41 = vpop.f32.mrb[1].mxu1  ;;  %v900_v19 = vadd.f32 %v1454_v11, %v2393_v13 }
 0x1be   : > { %v895_v44 = vadd.f32 %v2393_v13, %v894_v41 }
 0x1c3   : > { %v1494_v49 = vpop.f32.mrb[0].mxu0 }
 0x1c4   : > { %v1175_v48 = vadd.f32 %v1494_v49, %v900_v19  ;;  %v1095_v10 = vpop.f32.mrb[1].mxu0 }
 0x1c5   : > { %v1174_v31 = vadd.f32 %v1095_v10, %v895_v44 }
 0x1c6   : > { %v1198_v60 = vadd.f32 %v2403_v30, %v1175_v48 }
 0x1c7   : > { %v1197_v54 = vadd.f32 %v2403_v30, %v1174_v31 }
 0x1c8   : > { %1214 = vst [vmem:[%s2407_s15 + $0x8] sm:$0xff] %v1198_v60 }
 0x1c9   : > { %1213 = vst [vmem:[%s2407_s15] sm:$0xff] %v1197_v54  ;;  %v1457_v3 = vpop.f32.mrb[2].mxu1 }
 0x1ca   : > { %v904_v16 = vpop.f32.mrb[3].mxu1  ;;  %v910_v14 = vadd.f32 %v1457_v3, %v2393_v13 }
 0x1cb   : > { %v905_v0 = vadd.f32 %v2393_v13, %v904_v16 }
 0x1d3   : > { %v1497_v57 = vpop.f32.mrb[2].mxu0 }
 0x1d4   : > { %v1177_v53 = vadd.f32 %v1497_v57, %v910_v14  ;;  %v1105_v18 = vpop.f32.mrb[3].mxu0 }
 0x1d5   : > { %v1176_v59 = vadd.f32 %v1105_v18, %v905_v0 }
 0x1d6   : > { %v1200_v34 = vadd.f32 %v2403_v30, %v1177_v53 }
 0x1d7   : > { %v1199_v46 = vadd.f32 %v2403_v30, %v1176_v59 }
 0x1d8   : > { %1216 = vst [vmem:[%s2407_s15 + $0x18] sm:$0xff] %v1200_v34 }
 0x1d9   : > { %1215 = vst [vmem:[%s2407_s15 + $0x10] sm:$0xff] %v1199_v46  ;;  %v1460_v5 = vpop.f32.mrb[4].mxu1 }
 0x1da   : > { %v914_v7 = vpop.f32.mrb[5].mxu1  ;;  %v920_v25 = vadd.f32 %v1460_v5, %v2393_v13 }
 0x1db   : > { %v915_v23 = vadd.f32 %v2393_v13, %v914_v7 }
 0x1e3   : > { %v1500_v20 = vpop.f32.mrb[4].mxu0 }
 0x1e4   : > { %v1179_v47 = vadd.f32 %v1500_v20, %v920_v25  ;;  %v1115_v38 = vpop.f32.mrb[5].mxu0 }
 0x1e5   : > { %v1178_v43 = vadd.f32 %v1115_v38, %v915_v23 }
 0x1e6   : > { %v1202_v52 = vadd.f32 %v2403_v30, %v1179_v47 }
 0x1e7   : > { %v1201_v56 = vadd.f32 %v2403_v30, %v1178_v43 }
 0x1e8   : > { %1218 = vst [vmem:[%s2407_s15 + $0x28] sm:$0xff] %v1202_v52 }
 0x1e9   : > { %1217 = vst [vmem:[%s2407_s15 + $0x20] sm:$0xff] %v1201_v56  ;;  %v1463_v62 = vpop.f32.mrb[6].mxu1 }
 0x1ea   : > { %v924_v37 = vpop.f32.mrb[7].mxu1  ;;  %v930_v4 = vadd.f32 %v1463_v62, %v2393_v13 }
 0x1eb   : > { %v925_v36 = vadd.f32 %v2393_v13, %v924_v37 }
 0x1f3   : > { %v1503_v12 = vpop.f32.mrb[6].mxu0 }
 0x1f4   : > { %v1181_v17 = vadd.f32 %v1503_v12, %v930_v4  ;;  %v1125_v2 = vpop.f32.mrb[7].mxu0 }
 0x1f5   : > { %v1180_v33 = vadd.f32 %v1125_v2, %v925_v36 }
 0x1f6   : > { %v1204_v1 = vadd.f32 %v2403_v30, %v1181_v17 }
 0x1f7   : > { %v1203_v63 = vadd.f32 %v2403_v30, %v1180_v33 }
 0x1f8   : > { %1220 = vst [vmem:[%s2407_s15 + $0x38] sm:$0xff] %v1204_v1 }
 0x1f9   : > { %1219 = vst [vmem:[%s2407_s15 + $0x30] sm:$0xff] %v1203_v63  ;;  %v1466_v42 = vpop.f32.mrb[8].mxu1 }
 0x1fa   : > { %v934_v9 = vpop.f32.mrb[9].mxu1  ;;  %v940_v51 = vadd.f32 %v1466_v42, %v2393_v13 }
 0x1fb   : > { %v935_v21 = vadd.f32 %v2393_v13, %v934_v9 }
 0x203   : > { %v1506_v58 = vpop.f32.mrb[8].mxu0 }
 0x204   : > { %v1183_v24 = vadd.f32 %v1506_v58, %v940_v51  ;;  %v1135_v22 = vpop.f32.mrb[9].mxu0 }
 0x205   : > { %v1182_v27 = vadd.f32 %v1135_v22, %v935_v21 }
 0x206   : > { %v1206_v29 = vadd.f32 %v2403_v30, %v1183_v24 }
 0x207   : > { %v1205_v32 = vadd.f32 %v2403_v30, %v1182_v27 }
 0x208   : > { %1222 = vst [vmem:[%s2407_s15 + $0x48] sm:$0xff] %v1206_v29 }
 0x209   : > { %1221 = vst [vmem:[%s2407_s15 + $0x40] sm:$0xff] %v1205_v32  ;;  %v1469_v61 = vpop.f32.mrb[10].mxu1 }
 0x20a   : > { %v944_v26 = vpop.f32.mrb[11].mxu1  ;;  %v950_v28 = vadd.f32 %v1469_v61, %v2393_v13 }
 0x20b   : > { %v945_v15 = vadd.f32 %v2393_v13, %v944_v26 }
 0x213   : > { %v1509_v45 = vpop.f32.mrb[10].mxu0 }
 0x214   : > { %v1185_v40 = vadd.f32 %v1509_v45, %v950_v28  ;;  %v1145_v6 = vpop.f32.mrb[11].mxu0 }
 0x215   : > { %v1184_v50 = vadd.f32 %v1145_v6, %v945_v15 }
 0x216   : > { %v1208_v35 = vadd.f32 %v2403_v30, %v1185_v40 }
 0x217   : > { %v1207_v39 = vadd.f32 %v2403_v30, %v1184_v50 }
 0x218   : > { %1224 = vst [vmem:[%s2407_s15 + $0x58] sm:$0xff] %v1208_v35 }
 0x219   : > { %1223 = vst [vmem:[%s2407_s15 + $0x50] sm:$0xff] %v1207_v39  ;;  %v1472_v8 = vpop.f32.mrb[12].mxu1 }
 0x21a   : > { %v954_v55 = vpop.f32.mrb[13].mxu1  ;;  %v960_v11 = vadd.f32 %v1472_v8, %v2393_v13 }
 0x21b   : > { %v955_v41 = vadd.f32 %v2393_v13, %v954_v55 }
 0x223   : > { %v1512_v19 = vpop.f32.mrb[12].mxu0 }
 0x224   : > { %v1187_v44 = vadd.f32 %v1512_v19, %v960_v11  ;;  %v1155_v49 = vpop.f32.mrb[13].mxu0 }
 0x225   : > { %v1186_v48 = vadd.f32 %v1155_v49, %v955_v41 }
 0x226   : > { %v1210_v10 = vadd.f32 %v2403_v30, %v1187_v44 }
 0x227   : > { %v1209_v31 = vadd.f32 %v2403_v30, %v1186_v48 }
 0x228   : > { %1226 = vst [vmem:[%s2407_s15 + $0x68] sm:$0xff] %v1210_v10 }
 0x229   : > { %1225 = vst [vmem:[%s2407_s15 + $0x60] sm:$0xff] %v1209_v31  ;;  %v1475_v60 = vpop.f32.mrb[14].mxu1 }
 0x22a   : > { %v964_v54 = vpop.f32.mrb[15].mxu1  ;;  %v970_v3 = vadd.f32 %v1475_v60, %v2393_v13 }
 0x22b   : > { %v965_v16 = vadd.f32 %v2393_v13, %v964_v54 }
 0x22f   : > { %v1515_v14 = vpop.f32.mrb[14].mxu0 }
 0x230   : > { %v1189_v0 = vadd.f32 %v1515_v14, %v970_v3  ;;  %v1165_v57 = vpop.f32.mrb[15].mxu0 }
 0x231   : > { %v1188_v53 = vadd.f32 %v1165_v57, %v965_v16 }
 0x232   : > { %v1212_v18 = vadd.f32 %v2403_v30, %v1189_v0 }
 0x233   : > { %v1211_v13 = vadd.f32 %v2403_v30, %v1188_v53 }
 0x234   : > { %1228 = vst [vmem:[%s2407_s15 + $0x78] sm:$0xff] %v1212_v18 }
 0x235   : > { %1227 = vst [vmem:[%s2407_s15 + $0x70] sm:$0xff] %v1211_v13 }
 0x236   : > { %1755 = shalt.err (!%p1752_p7)
}
 0x237   : > { %s1756_s17 = scalar_lea.hbm %s2455_s20, 2048  ;;  %s1760_s14 = scalar_lea.hbm %s2511_s6, 4096 }
 0x238   : > { %p1757_p8 = scmp.ne.s32.totalorder %s2455_s20, %s1756_s17  ;;  %p1761_p1 = scmp.lt.u32.totalorder %s2455_s20, %s2511_s6 }
 0x239   : > { %p1762_p0 = scmp.lt.u32.totalorder %s1760_s14, %s1756_s17  ;;  %p1764_p6 = scmp.lt.u32.totalorder %s1756_s17, %s2455_s20 }
 0x23a   : > { %p1758_p11 = pnand %p1757_p8, %p2522_p9 }
 0x23b   : > { %p1763_p5 = por %p1762_p0, %p1761_p1 }
 0x23c   : > { %p1759_p13 = pneg %p1758_p11 }
 0x23d   : > { %p1765_p10 = por %p1764_p6, %p1763_p5 }
 0x23f   : > { %p1766_p12 = pnand %p1765_p10, %p1759_p13 }
 0x241   : > { %1769 = shalt.err (!%p1766_p12)
}
 0x242   : > { %s1814_s11 = smov 128   ;;  %s1815_s18 = smov 8  }
 0x243   : > { %1600 = dma.vmem_to_hbm [thread:$0]  (%p2522_p9), %s2457_s9, 2048, %s2455_s20, %s2464_s25, %s1814_s11, %s1814_s11, %s1815_s18  }
 0x244 PF: > { %p1612_p2 = scmp.ge.s32.totalorder %s1808_s24, 2  ;;  %s1258_s19 = sand.u32 1, %s1796_s21  }
 0x245   : > { %p2523_p3 = scmp.ne.s32.totalorder %s2516_s8, 0  ;;  %s1259_s26 = scalar_lea.sflag [#allocation4], %s1258_s19 }
 0x247   : > { %p1607_p4 = pnand %p1612_p2, %p2523_p3 }
 0x249   : > { %1791 = dma.done.wait (!%p1607_p4), %s1259_s26, 2048  }
 0x24a   : > { %1793 = vsyncadd (!%p1607_p4), %s1259_s26, 4294965248  ;;  %p17_p7 = scmp.ge.s32.totalorder %s1876_s27, 4   ;;  %s2524_s21 = smov %s1800_s22 }
 0x24b   : > { %s2525_s22 = smov %s1804_s23  ;;  %s2526_s23 = smov %s1887_s30 }
 0x24c   : > { %s2527_s24 = smov %s1876_s27  ;;  %19 = sbr.rel (!%p17_p7) target bundleno = 4 (0x4), region = 87 }
 0x253   :  { %1264 = vsyncpa [#allocation3], 1 }
 0x254   :  { %1266 = vsyncpa [#allocation3 + $0x1], 1 }
 0x255   :  { %1267 = vsyncpa [#allocation4], 1 }
 0x256   :  { %1269 = vsyncpa [#allocation4 + $0x1], 1 }

</bundles_post_ra>
